<compile_context>
chip_gen: v7x
topology: tpu7x:2x2x1
jax: 0.10.0
libtpu: 0.0.40
codegen_flags: <defaults>
</compile_context>

<pallas_src>
import functools
import math

import jax
import jax.numpy as jnp
from jax import lax
from jax.experimental import pallas as pl
from jax.experimental.pallas import tpu as pltpu

_LANES = 128            # lane width of the packed output slab
_WGT_OFF = 64           # weights live in lanes [_WGT_OFF, _WGT_OFF + top_k)
_SIGN_FIX = 0x7FFFFFFF  # flips the low 31 bits of negative floats' bit patterns
_INT32_MIN = -(2 ** 31)


def _round_up(x, m):
    return (x + m - 1) // m * m


def _moe_gate_kernel(x_ref, w_ref, out_ref, *, top_k, n_experts, norm_topk,
                     routed_scaling_factor, compute_dtype, sub_blocks):
    tm = x_ref.shape[0]
    tm_sub = tm // sub_blocks

    idx_bits = max(1, (n_experts - 1).bit_length())
    mask_b = (1 << idx_bits) - 1     # low bits reserved for the lane id
    inv_mask_b = ~mask_b             # negative python int -> 0xFFFF..00 pattern

    w = w_ref[...]                   # (H, E), VMEM-resident, single copy

    # Independent sub-tiles: sub-tile s+1's matmul has no data dependence on
    # sub-tile s's top-k, so the scheduler can overlap MXU with XLU/VPU/EUP.
    for s in range(sub_blocks):
        rows = pl.ds(s * tm_sub, tm_sub)
        x = x_ref[rows, :]
        if x.dtype != compute_dtype:
            x = x.astype(compute_dtype)

        logits = jnp.dot(x, w, preferred_element_type=jnp.float32)  # (tm_sub, E)

        # Pack (logit, lane) into one sortable int32 key:
        #   * flip low 31 bits of negative floats -> signed-int order == float order
        #   * low idx_bits hold (mask_b - lane) -> ties resolve to the lowest expert
        bits = pltpu.bitcast(logits, jnp.int32)
        key = jnp.where(bits < 0, bits ^ _SIGN_FIX, bits)
        lane = lax.broadcasted_iota(jnp.int32, logits.shape, 1)
        key = (key & inv_mask_b) | (mask_b - lane)

        col = lax.broadcasted_iota(jnp.int32, (tm_sub, _LANES), 1)
        packed = jnp.zeros((tm_sub, _LANES), jnp.int32)

        # Iterative top-k, fully unrolled (k is tiny): ONE cross-lane reduce/iter.
        for j in range(top_k):
            kmax = jnp.max(key, axis=-1, keepdims=True)        # (tm_sub, 1)
            idx = mask_b - (kmax & mask_b)                      # selected expert
            packed = jnp.where(col == j, idx, packed)
            packed = jnp.where(col == _WGT_OFF + j, kmax, packed)
            # keys are unique per lane -> exactly one lane is knocked out
            key = jnp.where(key == kmax, _INT32_MIN, key)

        # Reconstruct the selected logits (low idx_bits of the mantissa are
        # truncated; error <= 2^(idx_bits-24) relative, negligible for gating).
        vkey = packed & inv_mask_b
        vbits = jnp.where(vkey < 0, vkey ^ _SIGN_FIX, vkey)
        vals = pltpu.bitcast(vbits, jnp.float32)                # (tm_sub, 128)

        m0 = vals[:, _WGT_OFF:_WGT_OFF + 1]                     # top-1 logit == row max
        valid = (col >= _WGT_OFF) & (col < _WGT_OFF + top_k)
        e = jnp.where(valid, jnp.exp(vals - m0), 0.0)

        if norm_topk:
            # The full softmax denominator cancels with the top-k renormalization.
            # (epsilon lands on sum(exp(l - max)) >= 1 instead of sum of probs;
            #  difference is ~1e-20 relative, documented as acceptable.)
            denom = jnp.sum(e, axis=-1, keepdims=True) + 1e-20
            wgt = e * pl.reciprocal(denom, approx=False)
        else:
            z = jnp.sum(jnp.exp(logits - m0), axis=-1, keepdims=True)
            wgt = e * pl.reciprocal(z, approx=False) * routed_scaling_factor

        out_ref[rows, :] = jnp.where(col < _WGT_OFF, packed,
                                     pltpu.bitcast(wgt, jnp.int32))


def _device_vmem_capacity():
    cap = 64 * 1024 * 1024          # conservative default = v7x per-core VMEM
    try:
        info = pltpu.get_tpu_info()
        cap = int(getattr(info, "vmem_capacity_bytes", cap)) or cap
    except Exception:
        pass
    return cap


def moe_gate(hidden_states, weight, *, top_k, norm_topk_prob=True,
             routed_scaling_factor=1.0, block_tokens=1024, sub_blocks=2,
             matmul_dtype=None):
    """hidden_states: (bsz, seq, H); weight: (E, H). Returns (idx, weight, None)."""
    bsz, seq_len, h = hidden_states.shape
    n_experts, gating_dim = weight.shape
    assert gating_dim == h
    assert 0 < top_k <= n_experts
    assert top_k <= _WGT_OFF, "packed output layout assumes top_k <= 64"

    x = hidden_states.reshape(bsz * seq_len, h)
    t = x.shape[0]

    # Single explicit matmul dtype for both operands.
    if matmul_dtype is not None:
        compute_dtype = jnp.dtype(matmul_dtype)
    elif x.dtype == weight.dtype:
        compute_dtype = jnp.dtype(x.dtype)
    else:
        compute_dtype = jnp.promote_types(x.dtype, weight.dtype)

    # One-time transpose + cast of the small gate weight (E*H elements) in the
    # wrapper; the in-kernel dot then needs no per-tile relayout of W.
    w_t = jnp.transpose(weight).astype(compute_dtype)           # (H, E)

    # ---- token tiling -------------------------------------------------------
    tm = min(block_tokens, _round_up(t, 8))
    tm = max(8, _round_up(tm, 8))
    # Give the grid >= 2 steps when possible so both v7x TensorCores get work.
    if t >= 16 and pl.cdiv(t, tm) < 2:
        tm = _round_up(pl.cdiv(t, 2), 8)

    cap = _device_vmem_capacity()
    budget = cap - 12 * 1024 * 1024

    def vmem_estimate(tm_):
        cd = jnp.dtype(compute_dtype).itemsize
        est = 2 * tm_ * h * x.dtype.itemsize          # double-buffered x stream
        est += h * n_experts * cd                     # resident W^T (single copy)
        est += 2 * tm_ * _LANES * 4                   # double-buffered packed out
        tms = max(8, tm_ // max(1, sub_blocks))
        if x.dtype != compute_dtype:
            est += tms * h * cd                       # in-kernel cast temp
        est += tms * n_experts * 12                   # logits f32 + keys + exp
        est += tms * _LANES * 24                      # packed / vals / e / wgt
        return est + 2 * 1024 * 1024                  # slack

    while vmem_estimate(tm) > budget and tm > 8:
        tm = max(8, _round_up(tm // 2, 8))

    grid = (pl.cdiv(t, tm),)
    sub_eff = sub_blocks if (sub_blocks >= 1 and tm % (8 * sub_blocks) == 0) else 1

    vmem_limit = int(min(cap - 4 * 1024 * 1024,
                         max(vmem_estimate(tm) + 16 * 1024 * 1024,
                             32 * 1024 * 1024)))

    kernel = functools.partial(
        _moe_gate_kernel,
        top_k=top_k,
        n_experts=n_experts,
        norm_topk=bool(norm_topk_prob) and top_k > 1,
        routed_scaling_factor=float(routed_scaling_factor),
        compute_dtype=compute_dtype,
        sub_blocks=sub_eff,
    )

    packed = pl.pallas_call(
        kernel,
        out_shape=jax.ShapeDtypeStruct((t, _LANES), jnp.int32),
        grid=grid,
        in_specs=[
            pl.BlockSpec((tm, h), lambda i: (i, 0)),            # streamed tokens
            pl.BlockSpec(memory_space=pltpu.MemorySpace.VMEM),  # resident W^T
        ],
        out_specs=pl.BlockSpec((tm, _LANES), lambda i: (i, 0)),
        compiler_params=pltpu.CompilerParams(
            dimension_semantics=("parallel",),
            vmem_limit_bytes=vmem_limit),
    )(x, w_t)

    topk_idx = packed[:, :top_k]
    topk_weight = lax.bitcast_convert_type(
        packed[:, _WGT_OFF:_WGT_OFF + top_k], jnp.float32)
    return topk_idx, topk_weight, None


# ----------------------------- reference & test ------------------------------

def _reference(hidden_states, weight, top_k, norm_topk_prob=True,
               routed_scaling_factor=1.0):
    h = hidden_states.shape[-1]
    x = hidden_states.reshape(-1, h).astype(jnp.float32)
    logits = x @ weight.astype(jnp.float32).T
    scores = jax.nn.softmax(logits, axis=-1)
    w, idx = jax.lax.top_k(scores, top_k)
    if norm_topk_prob and top_k > 1:
        w = w / (jnp.sum(w, axis=-1, keepdims=True) + 1e-20)
    else:
        w = w * routed_scaling_factor
    return idx, w


def _canonical(idx, w):
    # torch.topk(..., sorted=False) returns an *unordered* set; compare by
    # sorting each row's (idx, weight) pairs by expert index.
    order = jnp.argsort(idx, axis=-1)
    return (jnp.take_along_axis(idx, order, axis=-1),
            jnp.take_along_axis(w, order, axis=-1))


if __name__ == "__main__":
    # Small shapes consistent with the module's forward (bsz, seq, hidden).
    bsz, seq_len, hidden = 2, 16, 64
    n_routed_experts = 16
    top_k = 6

    key = jax.random.PRNGKey(0)
    k_x, k_w, k_x2 = jax.random.split(key, 3)

    hidden_states = jax.random.normal(k_x, (bsz, seq_len, hidden), jnp.float32)
    # kaiming_uniform_(a=sqrt(5)) on (E, H): U(-b, b) with b = 1/sqrt(H)
    bound = 1.0 / math.sqrt(hidden)
    gate_weight = jax.random.uniform(
        k_w, (n_routed_experts, hidden), jnp.float32, minval=-bound, maxval=bound)

    # --- main path: greedy top-k + renormalization (config default) ----------
    idx, wgt, aux = moe_gate(hidden_states, gate_weight, top_k=top_k,
                             norm_topk_prob=True, routed_scaling_factor=1.0)
    jax.block_until_ready((idx, wgt))
    assert aux is None
    ref_idx, ref_w = _reference(hidden_states, gate_weight, top_k)
    ci, cw = _canonical(idx, wgt)
    ri, rw = _canonical(ref_idx, ref_w)
    assert jnp.array_equal(ci, ri), "top-k expert set mismatch"
    assert jnp.allclose(cw, rw, atol=2e-5, rtol=2e-5), "top-k weight mismatch"

    # --- ragged token count: exercises the un-padded partial last block ------
    hs2 = jax.random.normal(k_x2, (1, 21, hidden), jnp.float32)
    idx2, wgt2, _ = moe_gate(hs2, gate_weight, top_k=top_k, norm_topk_prob=True)
    jax.block_until_ready((idx2, wgt2))
    ref_idx2, ref_w2 = _reference(hs2, gate_weight, top_k)
    ci2, cw2 = _canonical(idx2, wgt2)
    ri2, rw2 = _canonical(ref_idx2, ref_w2)
    assert jnp.array_equal(ci2, ri2), "ragged: top-k expert set mismatch"
    assert jnp.allclose(cw2, rw2, atol=2e-5, rtol=2e-5), "ragged: weight mismatch"

    # --- non-renormalized (scaling) path --------------------------------------
    idx3, wgt3, _ = moe_gate(hidden_states, gate_weight, top_k=top_k,
                             norm_topk_prob=False, routed_scaling_factor=2.5)
    jax.block_until_ready((idx3, wgt3))
    ref_idx3, ref_w3 = _reference(hidden_states, gate_weight, top_k,
                                  norm_topk_prob=False, routed_scaling_factor=2.5)
    ci3, cw3 = _canonical(idx3, wgt3)
    ri3, rw3 = _canonical(ref_idx3, ref_w3)
    assert jnp.array_equal(ci3, ri3), "scaled: top-k expert set mismatch"
    assert jnp.allclose(cw3, rw3, atol=2e-5, rtol=2e-5), "scaled: weight mismatch"

    # --- bf16 gate-matmul option (main v5e lever): smoke test -----------------
    idx4, wgt4, _ = moe_gate(hidden_states, gate_weight, top_k=top_k,
                             matmul_dtype=jnp.bfloat16)
    jax.block_until_ready((idx4, wgt4))
    assert idx4.shape == (bsz * seq_len, top_k)
    assert wgt4.shape == (bsz * seq_len, top_k)
    assert bool(jnp.all((idx4 >= 0) & (idx4 < n_routed_experts)))
    assert bool(jnp.allclose(jnp.sum(wgt4, axis=-1), 1.0, atol=1e-3))

    print("KERNEL_OK")
</pallas_src>

<mosaic_0001>
module attributes {stable_mosaic.version = 11 : i64} {
  func.func @_moe_gate_kernel(%arg0: i32, %arg1: memref<16x64xf32, #tpu.memory_space<vmem>>, %arg2: memref<64x16xf32, #tpu.memory_space<vmem>>, %arg3: memref<16x128xi32, #tpu.memory_space<vmem>>) attributes {dimension_semantics = [#tpu.dimension_semantics<parallel>], iteration_bounds = array<i64: 2>, scalar_prefetch = 0 : i64, scratch_operands = 0 : i64, tpu.core_type = #tpu.core_type<tc>, window_params = [{transform_indices = @transform_0, window_bounds = array<i64: 16, 64>}, {pipeline_mode = #tpu.pipeline_mode<synchronous>, transform_indices = @transform_1, window_bounds = array<i64: 64, 16>}, {transform_indices = @transform_2, window_bounds = array<i64: 16, 128>}]} {
    %c0 = arith.constant 0 : index
    %c0_0 = arith.constant 0 : index
    %0 = vector.load %arg2[%c0, %c0_0] : memref<64x16xf32, #tpu.memory_space<vmem>>, vector<64x16xf32>
    %c0_1 = arith.constant 0 : index
    %c0_2 = arith.constant 0 : index
    %1 = vector.load %arg1[%c0_1, %c0_2] : memref<16x64xf32, #tpu.memory_space<vmem>>, vector<8x64xf32>
    %cst = arith.constant dense<0.000000e+00> : vector<8x16xf32>
    %2 = tpu.matmul %1, %0, %cst {dimension_numbers = #tpu.dot_dimension_numbers<[1], [0], [0], [1], [0, 0, 1, 1], [], []>} : vector<8x64xf32>, vector<64x16xf32>, vector<8x16xf32> -> vector<8x16xf32>
    %3 = tpu.bitcast %2 : vector<8x16xf32> -> vector<8x16xi32>
    %c0_i32 = arith.constant 0 : i32
    %4 = vector.broadcast %c0_i32 : i32 to vector<8x16xi32>
    %5 = arith.cmpi slt, %3, %4 : vector<8x16xi32>
    %c2147483647_i32 = arith.constant 2147483647 : i32
    %6 = vector.broadcast %c2147483647_i32 : i32 to vector<8x16xi32>
    %7 = arith.xori %3, %6 : vector<8x16xi32>
    %8 = arith.select %5, %7, %3 : vector<8x16xi1>, vector<8x16xi32>
    %9 = tpu.iota {dimensions = array<i32: 1>} : vector<8x16xi32>
    %c-16_i32 = arith.constant -16 : i32
    %10 = vector.broadcast %c-16_i32 : i32 to vector<8x16xi32>
    %11 = arith.andi %8, %10 : vector<8x16xi32>
    %c15_i32 = arith.constant 15 : i32
    %12 = vector.broadcast %c15_i32 : i32 to vector<8x16xi32>
    %13 = arith.subi %12, %9 : vector<8x16xi32>
    %14 = arith.ori %11, %13 : vector<8x16xi32>
    %15 = tpu.iota {dimensions = array<i32: 1>} : vector<8x128xi32>
    %c0_i32_3 = arith.constant 0 : i32
    %16 = vector.broadcast %c0_i32_3 : i32 to vector<8x128xi32>
    %cst_4 = arith.constant dense<-2147483648> : vector<8xi32>
    %17 = vector.multi_reduction <maxsi>, %14, %cst_4 [1] : vector<8x16xi32> to vector<8xi32>
    %18 = vector.shape_cast %17 : vector<8xi32> to vector<8x1xi32>
    %c15_i32_5 = arith.constant 15 : i32
    %19 = vector.broadcast %c15_i32_5 : i32 to vector<8x1xi32>
    %20 = arith.andi %18, %19 : vector<8x1xi32>
    %c15_i32_6 = arith.constant 15 : i32
    %21 = vector.broadcast %c15_i32_6 : i32 to vector<8x1xi32>
    %22 = arith.subi %21, %20 : vector<8x1xi32>
    %c0_i32_7 = arith.constant 0 : i32
    %23 = vector.broadcast %c0_i32_7 : i32 to vector<8x128xi32>
    %24 = arith.cmpi eq, %15, %23 : vector<8x128xi32>
    %25 = vector.shape_cast %22 : vector<8x1xi32> to vector<8x1xi32>
    %26 = vector.broadcast %25 : vector<8x1xi32> to vector<8x128xi32>
    %27 = arith.select %24, %26, %16 : vector<8x128xi1>, vector<8x128xi32>
    %c64_i32 = arith.constant 64 : i32
    %28 = vector.broadcast %c64_i32 : i32 to vector<8x128xi32>
    %29 = arith.cmpi eq, %15, %28 : vector<8x128xi32>
    %30 = vector.shape_cast %18 : vector<8x1xi32> to vector<8x1xi32>
    %31 = vector.broadcast %30 : vector<8x1xi32> to vector<8x128xi32>
    %32 = arith.select %29, %31, %27 : vector<8x128xi1>, vector<8x128xi32>
    %33 = vector.broadcast %18 : vector<8x1xi32> to vector<8x16xi32>
    %34 = arith.cmpi eq, %14, %33 : vector<8x16xi32>
    %c-2147483648_i32 = arith.constant -2147483648 : i32
    %35 = vector.broadcast %c-2147483648_i32 : i32 to vector<8x16xi32>
    %36 = arith.select %34, %35, %14 : vector<8x16xi1>, vector<8x16xi32>
    %cst_8 = arith.constant dense<-2147483648> : vector<8xi32>
    %37 = vector.multi_reduction <maxsi>, %36, %cst_8 [1] : vector<8x16xi32> to vector<8xi32>
    %38 = vector.shape_cast %37 : vector<8xi32> to vector<8x1xi32>
    %c15_i32_9 = arith.constant 15 : i32
    %39 = vector.broadcast %c15_i32_9 : i32 to vector<8x1xi32>
    %40 = arith.andi %38, %39 : vector<8x1xi32>
    %c15_i32_10 = arith.constant 15 : i32
    %41 = vector.broadcast %c15_i32_10 : i32 to vector<8x1xi32>
    %42 = arith.subi %41, %40 : vector<8x1xi32>
    %c1_i32 = arith.constant 1 : i32
    %43 = vector.broadcast %c1_i32 : i32 to vector<8x128xi32>
    %44 = arith.cmpi eq, %15, %43 : vector<8x128xi32>
    %45 = vector.shape_cast %42 : vector<8x1xi32> to vector<8x1xi32>
    %46 = vector.broadcast %45 : vector<8x1xi32> to vector<8x128xi32>
    %47 = arith.select %44, %46, %32 : vector<8x128xi1>, vector<8x128xi32>
    %c65_i32 = arith.constant 65 : i32
    %48 = vector.broadcast %c65_i32 : i32 to vector<8x128xi32>
    %49 = arith.cmpi eq, %15, %48 : vector<8x128xi32>
    %50 = vector.shape_cast %38 : vector<8x1xi32> to vector<8x1xi32>
    %51 = vector.broadcast %50 : vector<8x1xi32> to vector<8x128xi32>
    %52 = arith.select %49, %51, %47 : vector<8x128xi1>, vector<8x128xi32>
    %53 = vector.broadcast %38 : vector<8x1xi32> to vector<8x16xi32>
    %54 = arith.cmpi eq, %36, %53 : vector<8x16xi32>
    %c-2147483648_i32_11 = arith.constant -2147483648 : i32
    %55 = vector.broadcast %c-2147483648_i32_11 : i32 to vector<8x16xi32>
    %56 = arith.select %54, %55, %36 : vector<8x16xi1>, vector<8x16xi32>
    %cst_12 = arith.constant dense<-2147483648> : vector<8xi32>
    %57 = vector.multi_reduction <maxsi>, %56, %cst_12 [1] : vector<8x16xi32> to vector<8xi32>
    %58 = vector.shape_cast %57 : vector<8xi32> to vector<8x1xi32>
    %c15_i32_13 = arith.constant 15 : i32
    %59 = vector.broadcast %c15_i32_13 : i32 to vector<8x1xi32>
    %60 = arith.andi %58, %59 : vector<8x1xi32>
    %c15_i32_14 = arith.constant 15 : i32
    %61 = vector.broadcast %c15_i32_14 : i32 to vector<8x1xi32>
    %62 = arith.subi %61, %60 : vector<8x1xi32>
    %c2_i32 = arith.constant 2 : i32
    %63 = vector.broadcast %c2_i32 : i32 to vector<8x128xi32>
    %64 = arith.cmpi eq, %15, %63 : vector<8x128xi32>
    %65 = vector.shape_cast %62 : vector<8x1xi32> to vector<8x1xi32>
    %66 = vector.broadcast %65 : vector<8x1xi32> to vector<8x128xi32>
    %67 = arith.select %64, %66, %52 : vector<8x128xi1>, vector<8x128xi32>
    %c66_i32 = arith.constant 66 : i32
    %68 = vector.broadcast %c66_i32 : i32 to vector<8x128xi32>
    %69 = arith.cmpi eq, %15, %68 : vector<8x128xi32>
    %70 = vector.shape_cast %58 : vector<8x1xi32> to vector<8x1xi32>
    %71 = vector.broadcast %70 : vector<8x1xi32> to vector<8x128xi32>
    %72 = arith.select %69, %71, %67 : vector<8x128xi1>, vector<8x128xi32>
    %73 = vector.broadcast %58 : vector<8x1xi32> to vector<8x16xi32>
    %74 = arith.cmpi eq, %56, %73 : vector<8x16xi32>
    %c-2147483648_i32_15 = arith.constant -2147483648 : i32
    %75 = vector.broadcast %c-2147483648_i32_15 : i32 to vector<8x16xi32>
    %76 = arith.select %74, %75, %56 : vector<8x16xi1>, vector<8x16xi32>
    %cst_16 = arith.constant dense<-2147483648> : vector<8xi32>
    %77 = vector.multi_reduction <maxsi>, %76, %cst_16 [1] : vector<8x16xi32> to vector<8xi32>
    %78 = vector.shape_cast %77 : vector<8xi32> to vector<8x1xi32>
    %c15_i32_17 = arith.constant 15 : i32
    %79 = vector.broadcast %c15_i32_17 : i32 to vector<8x1xi32>
    %80 = arith.andi %78, %79 : vector<8x1xi32>
    %c15_i32_18 = arith.constant 15 : i32
    %81 = vector.broadcast %c15_i32_18 : i32 to vector<8x1xi32>
    %82 = arith.subi %81, %80 : vector<8x1xi32>
    %c3_i32 = arith.constant 3 : i32
    %83 = vector.broadcast %c3_i32 : i32 to vector<8x128xi32>
    %84 = arith.cmpi eq, %15, %83 : vector<8x128xi32>
    %85 = vector.shape_cast %82 : vector<8x1xi32> to vector<8x1xi32>
    %86 = vector.broadcast %85 : vector<8x1xi32> to vector<8x128xi32>
    %87 = arith.select %84, %86, %72 : vector<8x128xi1>, vector<8x128xi32>
    %c67_i32 = arith.constant 67 : i32
    %88 = vector.broadcast %c67_i32 : i32 to vector<8x128xi32>
    %89 = arith.cmpi eq, %15, %88 : vector<8x128xi32>
    %90 = vector.shape_cast %78 : vector<8x1xi32> to vector<8x1xi32>
    %91 = vector.broadcast %90 : vector<8x1xi32> to vector<8x128xi32>
    %92 = arith.select %89, %91, %87 : vector<8x128xi1>, vector<8x128xi32>
    %93 = vector.broadcast %78 : vector<8x1xi32> to vector<8x16xi32>
    %94 = arith.cmpi eq, %76, %93 : vector<8x16xi32>
    %c-2147483648_i32_19 = arith.constant -2147483648 : i32
    %95 = vector.broadcast %c-2147483648_i32_19 : i32 to vector<8x16xi32>
    %96 = arith.select %94, %95, %76 : vector<8x16xi1>, vector<8x16xi32>
    %cst_20 = arith.constant dense<-2147483648> : vector<8xi32>
    %97 = vector.multi_reduction <maxsi>, %96, %cst_20 [1] : vector<8x16xi32> to vector<8xi32>
    %98 = vector.shape_cast %97 : vector<8xi32> to vector<8x1xi32>
    %c15_i32_21 = arith.constant 15 : i32
    %99 = vector.broadcast %c15_i32_21 : i32 to vector<8x1xi32>
    %100 = arith.andi %98, %99 : vector<8x1xi32>
    %c15_i32_22 = arith.constant 15 : i32
    %101 = vector.broadcast %c15_i32_22 : i32 to vector<8x1xi32>
    %102 = arith.subi %101, %100 : vector<8x1xi32>
    %c4_i32 = arith.constant 4 : i32
    %103 = vector.broadcast %c4_i32 : i32 to vector<8x128xi32>
    %104 = arith.cmpi eq, %15, %103 : vector<8x128xi32>
    %105 = vector.shape_cast %102 : vector<8x1xi32> to vector<8x1xi32>
    %106 = vector.broadcast %105 : vector<8x1xi32> to vector<8x128xi32>
    %107 = arith.select %104, %106, %92 : vector<8x128xi1>, vector<8x128xi32>
    %c68_i32 = arith.constant 68 : i32
    %108 = vector.broadcast %c68_i32 : i32 to vector<8x128xi32>
    %109 = arith.cmpi eq, %15, %108 : vector<8x128xi32>
    %110 = vector.shape_cast %98 : vector<8x1xi32> to vector<8x1xi32>
    %111 = vector.broadcast %110 : vector<8x1xi32> to vector<8x128xi32>
    %112 = arith.select %109, %111, %107 : vector<8x128xi1>, vector<8x128xi32>
    %113 = vector.broadcast %98 : vector<8x1xi32> to vector<8x16xi32>
    %114 = arith.cmpi eq, %96, %113 : vector<8x16xi32>
    %c-2147483648_i32_23 = arith.constant -2147483648 : i32
    %115 = vector.broadcast %c-2147483648_i32_23 : i32 to vector<8x16xi32>
    %116 = arith.select %114, %115, %96 : vector<8x16xi1>, vector<8x16xi32>
    %cst_24 = arith.constant dense<-2147483648> : vector<8xi32>
    %117 = vector.multi_reduction <maxsi>, %116, %cst_24 [1] : vector<8x16xi32> to vector<8xi32>
    %118 = vector.shape_cast %117 : vector<8xi32> to vector<8x1xi32>
    %c15_i32_25 = arith.constant 15 : i32
    %119 = vector.broadcast %c15_i32_25 : i32 to vector<8x1xi32>
    %120 = arith.andi %118, %119 : vector<8x1xi32>
    %c15_i32_26 = arith.constant 15 : i32
    %121 = vector.broadcast %c15_i32_26 : i32 to vector<8x1xi32>
    %122 = arith.subi %121, %120 : vector<8x1xi32>
    %c5_i32 = arith.constant 5 : i32
    %123 = vector.broadcast %c5_i32 : i32 to vector<8x128xi32>
    %124 = arith.cmpi eq, %15, %123 : vector<8x128xi32>
    %125 = vector.shape_cast %122 : vector<8x1xi32> to vector<8x1xi32>
    %126 = vector.broadcast %125 : vector<8x1xi32> to vector<8x128xi32>
    %127 = arith.select %124, %126, %112 : vector<8x128xi1>, vector<8x128xi32>
    %c69_i32 = arith.constant 69 : i32
    %128 = vector.broadcast %c69_i32 : i32 to vector<8x128xi32>
    %129 = arith.cmpi eq, %15, %128 : vector<8x128xi32>
    %130 = vector.shape_cast %118 : vector<8x1xi32> to vector<8x1xi32>
    %131 = vector.broadcast %130 : vector<8x1xi32> to vector<8x128xi32>
    %132 = arith.select %129, %131, %127 : vector<8x128xi1>, vector<8x128xi32>
    %c-16_i32_27 = arith.constant -16 : i32
    %133 = vector.broadcast %c-16_i32_27 : i32 to vector<8x128xi32>
    %134 = arith.andi %132, %133 : vector<8x128xi32>
    %c0_i32_28 = arith.constant 0 : i32
    %135 = vector.broadcast %c0_i32_28 : i32 to vector<8x128xi32>
    %136 = arith.cmpi slt, %134, %135 : vector<8x128xi32>
    %c2147483647_i32_29 = arith.constant 2147483647 : i32
    %137 = vector.broadcast %c2147483647_i32_29 : i32 to vector<8x128xi32>
    %138 = arith.xori %134, %137 : vector<8x128xi32>
    %139 = arith.select %136, %138, %134 : vector<8x128xi1>, vector<8x128xi32>
    %140 = tpu.bitcast %139 : vector<8x128xi32> -> vector<8x128xf32>
    %141 = vector.extract_strided_slice %140 {offsets = [0, 64], sizes = [8, 1], strides = [1, 1]} : vector<8x128xf32> to vector<8x1xf32>
    %c64_i32_30 = arith.constant 64 : i32
    %142 = vector.broadcast %c64_i32_30 : i32 to vector<8x128xi32>
    %143 = arith.cmpi sge, %15, %142 : vector<8x128xi32>
    %c70_i32 = arith.constant 70 : i32
    %144 = vector.broadcast %c70_i32 : i32 to vector<8x128xi32>
    %145 = arith.cmpi slt, %15, %144 : vector<8x128xi32>
    %146 = arith.andi %143, %145 : vector<8x128xi1>
    %147 = vector.broadcast %141 : vector<8x1xf32> to vector<8x128xf32>
    %148 = arith.subf %140, %147 : vector<8x128xf32>
    %149 = math.exp %148 : vector<8x128xf32>
    %cst_31 = arith.constant 0.000000e+00 : f32
    %150 = vector.broadcast %cst_31 : f32 to vector<8x128xf32>
    %151 = arith.select %146, %149, %150 : vector<8x128xi1>, vector<8x128xf32>
    %cst_32 = arith.constant dense<0.000000e+00> : vector<8xf32>
    %152 = vector.multi_reduction <add>, %151, %cst_32 [1] : vector<8x128xf32> to vector<8xf32>
    %153 = vector.shape_cast %152 : vector<8xf32> to vector<8x1xf32>
    %cst_33 = arith.constant 9.99999968E-21 : f32
    %154 = vector.broadcast %cst_33 : f32 to vector<8x1xf32>
    %155 = arith.addf %153, %154 : vector<8x1xf32>
    %156 = tpu.reciprocal %155 : vector<8x1xf32> -> vector<8x1xf32>
    %157 = vector.broadcast %156 : vector<8x1xf32> to vector<8x128xf32>
    %158 = arith.mulf %151, %157 : vector<8x128xf32>
    %c64_i32_34 = arith.constant 64 : i32
    %159 = vector.broadcast %c64_i32_34 : i32 to vector<8x128xi32>
    %160 = arith.cmpi slt, %15, %159 : vector<8x128xi32>
    %161 = tpu.bitcast %158 : vector<8x128xf32> -> vector<8x128xi32>
    %162 = arith.select %160, %132, %161 : vector<8x128xi1>, vector<8x128xi32>
    %c0_35 = arith.constant 0 : index
    %c0_36 = arith.constant 0 : index
    %163 = vector.load %arg3[%c0_35, %c0_36] : memref<16x128xi32, #tpu.memory_space<vmem>>, vector<8x128xi32>
    tpu.vector_store %arg3[%c0_35, %c0_36], %162 {strides = array<i32>} : memref<16x128xi32, #tpu.memory_space<vmem>>, vector<8x128xi32>,
    %c8 = arith.constant 8 : index
    %c0_37 = arith.constant 0 : index
    %164 = vector.load %arg1[%c8, %c0_37] : memref<16x64xf32, #tpu.memory_space<vmem>>, vector<8x64xf32>
    %cst_38 = arith.constant dense<0.000000e+00> : vector<8x16xf32>
    %165 = tpu.matmul %164, %0, %cst_38 {dimension_numbers = #tpu.dot_dimension_numbers<[1], [0], [0], [1], [0, 0, 1, 1], [], []>} : vector<8x64xf32>, vector<64x16xf32>, vector<8x16xf32> -> vector<8x16xf32>
    %166 = tpu.bitcast %165 : vector<8x16xf32> -> vector<8x16xi32>
    %c0_i32_39 = arith.constant 0 : i32
    %167 = vector.broadcast %c0_i32_39 : i32 to vector<8x16xi32>
    %168 = arith.cmpi slt, %166, %167 : vector<8x16xi32>
    %c2147483647_i32_40 = arith.constant 2147483647 : i32
    %169 = vector.broadcast %c2147483647_i32_40 : i32 to vector<8x16xi32>
    %170 = arith.xori %166, %169 : vector<8x16xi32>
    %171 = arith.select %168, %170, %166 : vector<8x16xi1>, vector<8x16xi32>
    %172 = tpu.iota {dimensions = array<i32: 1>} : vector<8x16xi32>
    %c-16_i32_41 = arith.constant -16 : i32
    %173 = vector.broadcast %c-16_i32_41 : i32 to vector<8x16xi32>
    %174 = arith.andi %171, %173 : vector<8x16xi32>
    %c15_i32_42 = arith.constant 15 : i32
    %175 = vector.broadcast %c15_i32_42 : i32 to vector<8x16xi32>
    %176 = arith.subi %175, %172 : vector<8x16xi32>
    %177 = arith.ori %174, %176 : vector<8x16xi32>
    %178 = tpu.iota {dimensions = array<i32: 1>} : vector<8x128xi32>
    %c0_i32_43 = arith.constant 0 : i32
    %179 = vector.broadcast %c0_i32_43 : i32 to vector<8x128xi32>
    %cst_44 = arith.constant dense<-2147483648> : vector<8xi32>
    %180 = vector.multi_reduction <maxsi>, %177, %cst_44 [1] : vector<8x16xi32> to vector<8xi32>
    %181 = vector.shape_cast %180 : vector<8xi32> to vector<8x1xi32>
    %c15_i32_45 = arith.constant 15 : i32
    %182 = vector.broadcast %c15_i32_45 : i32 to vector<8x1xi32>
    %183 = arith.andi %181, %182 : vector<8x1xi32>
    %c15_i32_46 = arith.constant 15 : i32
    %184 = vector.broadcast %c15_i32_46 : i32 to vector<8x1xi32>
    %185 = arith.subi %184, %183 : vector<8x1xi32>
    %c0_i32_47 = arith.constant 0 : i32
    %186 = vector.broadcast %c0_i32_47 : i32 to vector<8x128xi32>
    %187 = arith.cmpi eq, %178, %186 : vector<8x128xi32>
    %188 = vector.shape_cast %185 : vector<8x1xi32> to vector<8x1xi32>
    %189 = vector.broadcast %188 : vector<8x1xi32> to vector<8x128xi32>
    %190 = arith.select %187, %189, %179 : vector<8x128xi1>, vector<8x128xi32>
    %c64_i32_48 = arith.constant 64 : i32
    %191 = vector.broadcast %c64_i32_48 : i32 to vector<8x128xi32>
    %192 = arith.cmpi eq, %178, %191 : vector<8x128xi32>
    %193 = vector.shape_cast %181 : vector<8x1xi32> to vector<8x1xi32>
    %194 = vector.broadcast %193 : vector<8x1xi32> to vector<8x128xi32>
    %195 = arith.select %192, %194, %190 : vector<8x128xi1>, vector<8x128xi32>
    %196 = vector.broadcast %181 : vector<8x1xi32> to vector<8x16xi32>
    %197 = arith.cmpi eq, %177, %196 : vector<8x16xi32>
    %c-2147483648_i32_49 = arith.constant -2147483648 : i32
    %198 = vector.broadcast %c-2147483648_i32_49 : i32 to vector<8x16xi32>
    %199 = arith.select %197, %198, %177 : vector<8x16xi1>, vector<8x16xi32>
    %cst_50 = arith.constant dense<-2147483648> : vector<8xi32>
    %200 = vector.multi_reduction <maxsi>, %199, %cst_50 [1] : vector<8x16xi32> to vector<8xi32>
    %201 = vector.shape_cast %200 : vector<8xi32> to vector<8x1xi32>
    %c15_i32_51 = arith.constant 15 : i32
    %202 = vector.broadcast %c15_i32_51 : i32 to vector<8x1xi32>
    %203 = arith.andi %201, %202 : vector<8x1xi32>
    %c15_i32_52 = arith.constant 15 : i32
    %204 = vector.broadcast %c15_i32_52 : i32 to vector<8x1xi32>
    %205 = arith.subi %204, %203 : vector<8x1xi32>
    %c1_i32_53 = arith.constant 1 : i32
    %206 = vector.broadcast %c1_i32_53 : i32 to vector<8x128xi32>
    %207 = arith.cmpi eq, %178, %206 : vector<8x128xi32>
    %208 = vector.shape_cast %205 : vector<8x1xi32> to vector<8x1xi32>
    %209 = vector.broadcast %208 : vector<8x1xi32> to vector<8x128xi32>
    %210 = arith.select %207, %209, %195 : vector<8x128xi1>, vector<8x128xi32>
    %c65_i32_54 = arith.constant 65 : i32
    %211 = vector.broadcast %c65_i32_54 : i32 to vector<8x128xi32>
    %212 = arith.cmpi eq, %178, %211 : vector<8x128xi32>
    %213 = vector.shape_cast %201 : vector<8x1xi32> to vector<8x1xi32>
    %214 = vector.broadcast %213 : vector<8x1xi32> to vector<8x128xi32>
    %215 = arith.select %212, %214, %210 : vector<8x128xi1>, vector<8x128xi32>
    %216 = vector.broadcast %201 : vector<8x1xi32> to vector<8x16xi32>
    %217 = arith.cmpi eq, %199, %216 : vector<8x16xi32>
    %c-2147483648_i32_55 = arith.constant -2147483648 : i32
    %218 = vector.broadcast %c-2147483648_i32_55 : i32 to vector<8x16xi32>
    %219 = arith.select %217, %218, %199 : vector<8x16xi1>, vector<8x16xi32>
    %cst_56 = arith.constant dense<-2147483648> : vector<8xi32>
    %220 = vector.multi_reduction <maxsi>, %219, %cst_56 [1] : vector<8x16xi32> to vector<8xi32>
    %221 = vector.shape_cast %220 : vector<8xi32> to vector<8x1xi32>
    %c15_i32_57 = arith.constant 15 : i32
    %222 = vector.broadcast %c15_i32_57 : i32 to vector<8x1xi32>
    %223 = arith.andi %221, %222 : vector<8x1xi32>
    %c15_i32_58 = arith.constant 15 : i32
    %224 = vector.broadcast %c15_i32_58 : i32 to vector<8x1xi32>
    %225 = arith.subi %224, %223 : vector<8x1xi32>
    %c2_i32_59 = arith.constant 2 : i32
    %226 = vector.broadcast %c2_i32_59 : i32 to vector<8x128xi32>
    %227 = arith.cmpi eq, %178, %226 : vector<8x128xi32>
    %228 = vector.shape_cast %225 : vector<8x1xi32> to vector<8x1xi32>
    %229 = vector.broadcast %228 : vector<8x1xi32> to vector<8x128xi32>
    %230 = arith.select %227, %229, %215 : vector<8x128xi1>, vector<8x128xi32>
    %c66_i32_60 = arith.constant 66 : i32
    %231 = vector.broadcast %c66_i32_60 : i32 to vector<8x128xi32>
    %232 = arith.cmpi eq, %178, %231 : vector<8x128xi32>
    %233 = vector.shape_cast %221 : vector<8x1xi32> to vector<8x1xi32>
    %234 = vector.broadcast %233 : vector<8x1xi32> to vector<8x128xi32>
    %235 = arith.select %232, %234, %230 : vector<8x128xi1>, vector<8x128xi32>
    %236 = vector.broadcast %221 : vector<8x1xi32> to vector<8x16xi32>
    %237 = arith.cmpi eq, %219, %236 : vector<8x16xi32>
    %c-2147483648_i32_61 = arith.constant -2147483648 : i32
    %238 = vector.broadcast %c-2147483648_i32_61 : i32 to vector<8x16xi32>
    %239 = arith.select %237, %238, %219 : vector<8x16xi1>, vector<8x16xi32>
    %cst_62 = arith.constant dense<-2147483648> : vector<8xi32>
    %240 = vector.multi_reduction <maxsi>, %239, %cst_62 [1] : vector<8x16xi32> to vector<8xi32>
    %241 = vector.shape_cast %240 : vector<8xi32> to vector<8x1xi32>
    %c15_i32_63 = arith.constant 15 : i32
    %242 = vector.broadcast %c15_i32_63 : i32 to vector<8x1xi32>
    %243 = arith.andi %241, %242 : vector<8x1xi32>
    %c15_i32_64 = arith.constant 15 : i32
    %244 = vector.broadcast %c15_i32_64 : i32 to vector<8x1xi32>
    %245 = arith.subi %244, %243 : vector<8x1xi32>
    %c3_i32_65 = arith.constant 3 : i32
    %246 = vector.broadcast %c3_i32_65 : i32 to vector<8x128xi32>
    %247 = arith.cmpi eq, %178, %246 : vector<8x128xi32>
    %248 = vector.shape_cast %245 : vector<8x1xi32> to vector<8x1xi32>
    %249 = vector.broadcast %248 : vector<8x1xi32> to vector<8x128xi32>
    %250 = arith.select %247, %249, %235 : vector<8x128xi1>, vector<8x128xi32>
    %c67_i32_66 = arith.constant 67 : i32
    %251 = vector.broadcast %c67_i32_66 : i32 to vector<8x128xi32>
    %252 = arith.cmpi eq, %178, %251 : vector<8x128xi32>
    %253 = vector.shape_cast %241 : vector<8x1xi32> to vector<8x1xi32>
    %254 = vector.broadcast %253 : vector<8x1xi32> to vector<8x128xi32>
    %255 = arith.select %252, %254, %250 : vector<8x128xi1>, vector<8x128xi32>
    %256 = vector.broadcast %241 : vector<8x1xi32> to vector<8x16xi32>
    %257 = arith.cmpi eq, %239, %256 : vector<8x16xi32>
    %c-2147483648_i32_67 = arith.constant -2147483648 : i32
    %258 = vector.broadcast %c-2147483648_i32_67 : i32 to vector<8x16xi32>
    %259 = arith.select %257, %258, %239 : vector<8x16xi1>, vector<8x16xi32>
    %cst_68 = arith.constant dense<-2147483648> : vector<8xi32>
    %260 = vector.multi_reduction <maxsi>, %259, %cst_68 [1] : vector<8x16xi32> to vector<8xi32>
    %261 = vector.shape_cast %260 : vector<8xi32> to vector<8x1xi32>
    %c15_i32_69 = arith.constant 15 : i32
    %262 = vector.broadcast %c15_i32_69 : i32 to vector<8x1xi32>
    %263 = arith.andi %261, %262 : vector<8x1xi32>
    %c15_i32_70 = arith.constant 15 : i32
    %264 = vector.broadcast %c15_i32_70 : i32 to vector<8x1xi32>
    %265 = arith.subi %264, %263 : vector<8x1xi32>
    %c4_i32_71 = arith.constant 4 : i32
    %266 = vector.broadcast %c4_i32_71 : i32 to vector<8x128xi32>
    %267 = arith.cmpi eq, %178, %266 : vector<8x128xi32>
    %268 = vector.shape_cast %265 : vector<8x1xi32> to vector<8x1xi32>
    %269 = vector.broadcast %268 : vector<8x1xi32> to vector<8x128xi32>
    %270 = arith.select %267, %269, %255 : vector<8x128xi1>, vector<8x128xi32>
    %c68_i32_72 = arith.constant 68 : i32
    %271 = vector.broadcast %c68_i32_72 : i32 to vector<8x128xi32>
    %272 = arith.cmpi eq, %178, %271 : vector<8x128xi32>
    %273 = vector.shape_cast %261 : vector<8x1xi32> to vector<8x1xi32>
    %274 = vector.broadcast %273 : vector<8x1xi32> to vector<8x128xi32>
    %275 = arith.select %272, %274, %270 : vector<8x128xi1>, vector<8x128xi32>
    %276 = vector.broadcast %261 : vector<8x1xi32> to vector<8x16xi32>
    %277 = arith.cmpi eq, %259, %276 : vector<8x16xi32>
    %c-2147483648_i32_73 = arith.constant -2147483648 : i32
    %278 = vector.broadcast %c-2147483648_i32_73 : i32 to vector<8x16xi32>
    %279 = arith.select %277, %278, %259 : vector<8x16xi1>, vector<8x16xi32>
    %cst_74 = arith.constant dense<-2147483648> : vector<8xi32>
    %280 = vector.multi_reduction <maxsi>, %279, %cst_74 [1] : vector<8x16xi32> to vector<8xi32>
    %281 = vector.shape_cast %280 : vector<8xi32> to vector<8x1xi32>
    %c15_i32_75 = arith.constant 15 : i32
    %282 = vector.broadcast %c15_i32_75 : i32 to vector<8x1xi32>
    %283 = arith.andi %281, %282 : vector<8x1xi32>
    %c15_i32_76 = arith.constant 15 : i32
    %284 = vector.broadcast %c15_i32_76 : i32 to vector<8x1xi32>
    %285 = arith.subi %284, %283 : vector<8x1xi32>
    %c5_i32_77 = arith.constant 5 : i32
    %286 = vector.broadcast %c5_i32_77 : i32 to vector<8x128xi32>
    %287 = arith.cmpi eq, %178, %286 : vector<8x128xi32>
    %288 = vector.shape_cast %285 : vector<8x1xi32> to vector<8x1xi32>
    %289 = vector.broadcast %288 : vector<8x1xi32> to vector<8x128xi32>
    %290 = arith.select %287, %289, %275 : vector<8x128xi1>, vector<8x128xi32>
    %c69_i32_78 = arith.constant 69 : i32
    %291 = vector.broadcast %c69_i32_78 : i32 to vector<8x128xi32>
    %292 = arith.cmpi eq, %178, %291 : vector<8x128xi32>
    %293 = vector.shape_cast %281 : vector<8x1xi32> to vector<8x1xi32>
    %294 = vector.broadcast %293 : vector<8x1xi32> to vector<8x128xi32>
    %295 = arith.select %292, %294, %290 : vector<8x128xi1>, vector<8x128xi32>
    %c-16_i32_79 = arith.constant -16 : i32
    %296 = vector.broadcast %c-16_i32_79 : i32 to vector<8x128xi32>
    %297 = arith.andi %295, %296 : vector<8x128xi32>
    %c0_i32_80 = arith.constant 0 : i32
    %298 = vector.broadcast %c0_i32_80 : i32 to vector<8x128xi32>
    %299 = arith.cmpi slt, %297, %298 : vector<8x128xi32>
    %c2147483647_i32_81 = arith.constant 2147483647 : i32
    %300 = vector.broadcast %c2147483647_i32_81 : i32 to vector<8x128xi32>
    %301 = arith.xori %297, %300 : vector<8x128xi32>
    %302 = arith.select %299, %301, %297 : vector<8x128xi1>, vector<8x128xi32>
    %303 = tpu.bitcast %302 : vector<8x128xi32> -> vector<8x128xf32>
    %304 = vector.extract_strided_slice %303 {offsets = [0, 64], sizes = [8, 1], strides = [1, 1]} : vector<8x128xf32> to vector<8x1xf32>
    %c64_i32_82 = arith.constant 64 : i32
    %305 = vector.broadcast %c64_i32_82 : i32 to vector<8x128xi32>
    %306 = arith.cmpi sge, %178, %305 : vector<8x128xi32>
    %c70_i32_83 = arith.constant 70 : i32
    %307 = vector.broadcast %c70_i32_83 : i32 to vector<8x128xi32>
    %308 = arith.cmpi slt, %178, %307 : vector<8x128xi32>
    %309 = arith.andi %306, %308 : vector<8x128xi1>
    %310 = vector.broadcast %304 : vector<8x1xf32> to vector<8x128xf32>
    %311 = arith.subf %303, %310 : vector<8x128xf32>
    %312 = math.exp %311 : vector<8x128xf32>
    %cst_84 = arith.constant 0.000000e+00 : f32
    %313 = vector.broadcast %cst_84 : f32 to vector<8x128xf32>
    %314 = arith.select %309, %312, %313 : vector<8x128xi1>, vector<8x128xf32>
    %cst_85 = arith.constant dense<0.000000e+00> : vector<8xf32>
    %315 = vector.multi_reduction <add>, %314, %cst_85 [1] : vector<8x128xf32> to vector<8xf32>
    %316 = vector.shape_cast %315 : vector<8xf32> to vector<8x1xf32>
    %cst_86 = arith.constant 9.99999968E-21 : f32
    %317 = vector.broadcast %cst_86 : f32 to vector<8x1xf32>
    %318 = arith.addf %316, %317 : vector<8x1xf32>
    %319 = tpu.reciprocal %318 : vector<8x1xf32> -> vector<8x1xf32>
    %320 = vector.broadcast %319 : vector<8x1xf32> to vector<8x128xf32>
    %321 = arith.mulf %314, %320 : vector<8x128xf32>
    %c64_i32_87 = arith.constant 64 : i32
    %322 = vector.broadcast %c64_i32_87 : i32 to vector<8x128xi32>
    %323 = arith.cmpi slt, %178, %322 : vector<8x128xi32>
    %324 = tpu.bitcast %321 : vector<8x128xf32> -> vector<8x128xi32>
    %325 = arith.select %323, %295, %324 : vector<8x128xi1>, vector<8x128xi32>
    %c8_88 = arith.constant 8 : index
    %c0_89 = arith.constant 0 : index
    %326 = vector.load %arg3[%c8_88, %c0_89] : memref<16x128xi32, #tpu.memory_space<vmem>>, vector<8x128xi32>
    tpu.vector_store %arg3[%c8_88, %c0_89], %325 {strides = array<i32>} : memref<16x128xi32, #tpu.memory_space<vmem>>, vector<8x128xi32>,
    return
  }
  func.func @transform_0(%arg0: i32) -> (i32, i32) {
    %c0_i32 = arith.constant 0 : i32
    %c0_i32_0 = arith.constant 0 : i32
    return %arg0, %c0_i32 : i32, i32
  }
  func.func @transform_1(%arg0: i32) -> (i32, i32) {
    %c0_i32 = arith.constant 0 : i32
    %c0_i32_0 = arith.constant 0 : i32
    %c0_i32_1 = arith.constant 0 : i32
    return %c0_i32, %c0_i32_0 : i32, i32
  }
  func.func @transform_2(%arg0: i32) -> (i32, i32) {
    %c0_i32 = arith.constant 0 : i32
    %c0_i32_0 = arith.constant 0 : i32
    return %arg0, %c0_i32 : i32, i32
  }
}

</mosaic_0001>

<bundles_post_ra>
// kernel: tpu_custom_call.1
= control target key start
LH: loop header
LB: loop body
LE: loop exit
PB: predicated region body
PF: predicated region fallthrough
CT: control target
= control target key end

     0   :  { %7 = vsyncpa [#allocation3], 0  ;;  %s1132_s0 = inlined_call_operand.vmem [shape: f32[32,64], index: 0, kind: input, shape index: {}]   ;;  %s1133_s1 = inlined_call_operand.vmem [shape: f32[64,16], index: 1, kind: input, shape index: {}]   ;;  %s1134_s2 = inlined_call_operand.hbm [shape: s32[32,128], index: 2, kind: output, shape index: {}]  }
   0x1   :  { %9 = vsyncpa [#allocation3 + $0x1], 0  ;;  %s936_s9 = smov 0   ;;  %s938_s10 = smov 0  }
   0x2   :  { %s940_s11 = smov 0   ;;  %s942_s12 = smov 0  }
   0x3 LB: > { %s957_s13 = sadd.s32 4294967295, %s912_s12   ;;  %s700_s14 = sadd.s32 4294967294, %s912_s12   ;;  %s912_s12 = sphi %s942_s12, %s1140_s12   ;;  %s908_s11 = sphi %s940_s11, %s1139_s11   ;;  %s904_s10 = sphi %s938_s10, %s1138_s10   ;;  %s900_s9 = sphi %s936_s9, %s1137_s9  }
   0x4   : > { %s961_s15 = sadd.s32 1, %s912_s12   ;;  %s69_s16 = sadd.s32 1, %s908_s11 }
   0x5   : > { %s66_s17 = ssub.s32 %s912_s12, %s961_s15  ;;  %p79_p0 = scmp.ne.s32.totalorder %s908_s11, %s904_s10 }
   0x6   : > { %p67_p1 = scmp.eq.s32.totalorder %s66_s17, 0  ;;  %p80_p2 = scmp.eq.s32.totalorder %s957_s13, 1 }
   0x7   : > { %p85_p3 = scmp.ne.s32.totalorder %s904_s10, %s900_s9  ;;  %p86_p4 = scmp.eq.s32.totalorder %s700_s14, 1 }
   0x8   : > { %s972_s18 = scalar_select %p67_p1, %s908_s11, %s69_s16  }
   0x9   : > { %p974_p5 = por %p80_p2, %p79_p0  ;;  %p978_p6 = por %p86_p4, %p85_p3 }
   0xa   : > { %p703_p7 = scmp.ge.s32.totalorder %s912_s12, 1  ;;  %p116_p8 = scmp.lt.s32.totalorder %s912_s12, 3 }
   0xc   : > { %p117_p9 = pnand %p703_p7, %p116_p8 }
   0xd   : > { %v145_v0 = vld [vmem:[%s1133_s1] sm:$0xff] (!%p117_p9)  ;;  %v146_v1 = vld [vmem:[%s1133_s1 + $0x8] sm:$0xff] (!%p117_p9)  ;;  %v147_v2 = vld [vmem:[%s1133_s1 + $0x10] sm:$0xff] (!%p117_p9)  ;;  %v914_v3 = vmov (!%p117_p9), 0.0|0.0   ;;  %s705_s29 = sshll.u32 (!%p117_p9), %s957_s13, 1  ;;  %vm915_vm0 = vmmov (!%p117_p9), 0   ;;  %v232_v16 = vlaneseq (!%p117_p9) }
   0xe   : > { %120 = sbr.rel (%p117_p9) target bundleno = 2362 (0x93a), region = 28  ;;  %771 = vmatprep.subr.bf16.mxu0 (!%p117_p9), %v914_v3  ;;  %v772_v4 = vpack.c.bf16 (!%p117_p9), %v146_v1, %v145_v0  ;;  %783 = vmatprep.subr.bf16.mxu1 (!%p117_p9), %v914_v3  ;;  %v148_v5 = vld [vmem:[%s1133_s1 + $0x18] sm:$0xff] (!%p117_p9)  ;;  %v916_v6 = vmov (!%p117_p9), 0.0   ;;  %p139_p10 = scmp.lt.s32.totalorder (!%p117_p9), %s705_s29, 3  ;;  %v149_v8 = vld [vmem:[%s1133_s1 + $0x20] sm:$0xff] (!%p117_p9)  ;;  %v150_v9 = vld [vmem:[%s1133_s1 + $0x28] sm:$0xff] (!%p117_p9) }
   0xf   : > { %749 = vmatprep.mubr.msk.f32.mxu0 (!%p117_p9), %vm915_vm0, %v916_v6  ;;  %768 = vmatprep.mubr.msk.f32.mxu1 (!%p117_p9), %vm915_vm0, %v916_v6  ;;  %v775_v7 = vpack.c.bf16 (!%p117_p9), %v148_v5, %v147_v2  ;;  %v778_v10 = vpack.c.bf16 (!%p117_p9), %v150_v9, %v149_v8  ;;  %v151_v11 = vld [vmem:[%s1133_s1 + $0x30] sm:$0xff] (!%p117_p9)  ;;  %v152_v12 = vld [vmem:[%s1133_s1 + $0x38] sm:$0xff] (!%p117_p9)  ;;  %vm154_vm1 = vcmask (!%p117_p9), 523264   ;;  %v1012_v17 = vand.u32 (!%p117_p9), 127, %v232_v16  ;;  %s135_s23 = sand.u32 (!%p117_p9), 1, %s904_s10   ;;  %s714_s25 = sshll.u32 (!%p117_p9), %s957_s13, 8 }
  0x10   : > { %773 = vmatpush3.bf16.msra.mxu0 (!%p117_p9), %v772_v4  ;;  %785 = vmatpush3.bf16.msra.mxu1 (!%p117_p9), %v772_v4  ;;  %v781_v13 = vpack.c.bf16 (!%p117_p9), %v152_v12, %v151_v11  ;;  %vm237_vm4 = vcmask (!%p117_p9), 130048   ;;  %s704_s24 = sshll.u32 (!%p117_p9), %s135_s23, 4  ;;  %s1087_s30 = scalar_lea.hbm (!%p117_p9), %s1134_s2, %s714_s25 }
  0x11   : > { %774 = vmatprep.subr.bf16.mxu0 (!%p117_p9), %v914_v3  ;;  %786 = vmatprep.subr.bf16.mxu1 (!%p117_p9), %v914_v3  ;;  %v235_v23 = vsub.s32 (!%p117_p9), 15, %v1012_v17  ;;  %vm255_vm11 = vcmp.eq.s32.totalorder (!%p117_p9), %v1012_v17, 0  ;;  %vm257_vm12 = vcmp.eq.s32.totalorder (!%p117_p9), %v1012_v17, 64  ;;  %vm278_vm14 = vcmp.eq.s32.totalorder (!%p117_p9), %v1012_v17, 1  ;;  %s137_s26 = scalar_lea.vmem (!%p117_p9), [#allocation2], %s704_s24  ;;  %s1091_s3 = scalar_lea.sflag (!%p117_p9), [#allocation3], %s135_s23 }
  0x12   : > { %vm280_vm15 = vcmp.eq.s32.totalorder (!%p117_p9), %v1012_v17, 65  ;;  %s638_s27 = sshll.u32 (!%p117_p9), %s137_s26, 4  ;;  %s918_s4 = smov (!%p117_p9), [#allocation2]   ;;  %s1089_s27 = int_to_ptr.vmem [resolvable:$true] %s638_s27 }
  0x13   : > { %s850_s13 = scalar_lea.vmem (!%p117_p9), %s1089_s27, 256  ;;  %s854_s5 = sshll.u32 (!%p117_p9), %s918_s4, 4  ;;  %s855_s5 = int_to_ptr.vmem [resolvable:$false] %s854_s5 }
  0x14   : > { %776 = vmatpush3.bf16.msra.mxu0 (!%p117_p9), %v775_v7  ;;  %788 = vmatpush3.bf16.msra.mxu1 (!%p117_p9), %v775_v7  ;;  %p851_p11 = scmp.ne.s32.totalorder (!%p117_p9), %s1089_s27, %s850_s13  ;;  %s856_s6 = scalar_lea.vmem (!%p117_p9), %s855_s5, 512 }
  0x15   : > { %s1142_s29 = smov (!%p139_p10, %s705_s29), 3  ;;  %777 = vmatprep.subr.bf16.mxu0 %v914_v3  ;;  %789 = vmatprep.subr.bf16.mxu1 %v914_v3  ;;  %p857_p0 = scmp.lt.s32.totalorder %s1089_s27, %s855_s5 }
  0x16   : > { %s706_s16 = sshll.u32 %s1142_s29, 3  ;;  %p852_p12 = pnand %p851_p11, %p974_p5 }
  0x17   : > { %s142_s22 = scalar_lea.vmem %s1132_s0, %s706_s16  ;;  %p858_p1 = scmp.lt.s32.totalorder %s856_s6, %s850_s13 }
  0x18   : > { %779 = vmatpush3.bf16.msra.mxu0 %v778_v10  ;;  %791 = vmatpush3.bf16.msra.mxu1 %v778_v10  ;;  %v153_v14 = vld [vmem:[%s142_s22] sm:$0xff]  ;;  %v399_v15 = vld [vmem:[%s142_s22 + $0x8] sm:$0xff]  ;;  %p853_p13 = pneg %p852_p12 }
  0x19   : > { %780 = vmatprep.subr.bf16.mxu0 %v914_v3  ;;  %792 = vmatprep.subr.bf16.mxu1 %v914_v3  ;;  %p859_p2 = por %p858_p1, %p857_p0 }
  0x1b   : > { %p860_p3 = pnand %p859_p2, %p853_p13 }
  0x1c   : > { %782 = vmatpush3.bf16.msra.mxu0 %v781_v13  ;;  %794 = vmatpush3.bf16.msra.mxu1 %v781_v13 }
  0x1f   : > { %750 = vmatmul.mubr.msk.f32.vlgmr.msra.gmra.mrb[0].mxu0 %vm154_vm1, %v153_v14  ;;  %769 = vmatmul.mubr.msk.f32.vlgmr.msra.gmra.mrb[0].mxu1 %vm154_vm1, %v399_v15 }
  0xf2   : > { %v224_v18 = vpop.f32.mrb[0].mxu0  ;;  %v469_v19 = vpop.f32.mrb[0].mxu1 }
  0xf3   : > { %vm229_vm2 = vcmp.lt.s32.totalorder %v224_v18, 0  ;;  %v230_v20 = vxor.u32 2147483647, %v224_v18  ;;  %v751_v21 = vpop.f32.mrb[1].mxu0  ;;  %vm474_vm3 = vcmp.lt.s32.totalorder %v469_v19, 0  ;;  %v770_v22 = vpop.f32.mrb[1].mxu1 }
  0xf4   : > { %v475_v24 = vxor.u32 2147483647, %v469_v19 }
  0xf5   : > { %v231_v25 = vsel %vm229_vm2, %v230_v20, %v224_v18 }
  0xf6   : > { %v234_v26 = vand.u32 4294967280, %v231_v25  ;;  %v476_v27 = vsel %vm474_vm3, %v475_v24, %v469_v19 }
  0xf7   : > { %v477_v28 = vand.u32 4294967280, %v476_v27 }
  0xf8   : > { %v236_v29 = vor.u32 %v235_v23, %v234_v26 }
  0xf9   : > { %v478_v30 = vor.u32 %v477_v28, %v235_v23 }
  0xfa   : > { %v238_v31 = vsel %vm237_vm4, %v236_v29, 2147483648 }
  0xfb   : > { %v240_v32 = vshra.s32 %v238_v31, 16  ;;  %v479_v33 = vsel %vm237_vm4, %v478_v30, 2147483648  ;;  %v239_v37 = vand.u32 65535, %v238_v31 }
  0xfc   : > { %v481_v35 = vshra.s32 %v479_v33, 16  ;;  %v480_v40 = vand.u32 65535, %v479_v33 }
  0xfd   : > { %v242_v34 = vcvt.s32.f32 %v240_v32  ;;  %v241_v39 = vcvt.s32.f32 %v239_v37 }
  0xfe   : > { %v483_v36 = vcvt.s32.f32 %v481_v35  ;;  %v482_v43 = vcvt.s32.f32 %v480_v40 }
  0xff   : > { %243 = vmax.xlane.f32.xlu0 %v242_v34 }
 0x103   : > { %484 = vmax.xlane.f32.xlu0 %v483_v36 }
 0x18c   : > { %v244_v38 = vpop.xlane.xlu0 %243 }
 0x18d   : > { %vm245_vm5 = vcmp.eq.f32.partialorder %v242_v34, %v244_v38  ;;  %v250_v45 = vcvt.f32.s32 %v244_v38 }
 0x18e   : > { %v246_v41 = vsel %vm245_vm5, %v241_v39, -inf  ;;  %vm301_vm5 = vcmp.eq.s32.totalorder %v1012_v17, 2 }
 0x18f   : > { %247 = vmax.xlane.f32.xlu1 %v246_v41  ;;  %v251_v47 = vshll.u32 %v250_v45, 16 }
 0x190   : > { %v485_v42 = vpop.xlane.xlu0 %484 }
 0x191   : > { %vm486_vm6 = vcmp.eq.f32.partialorder %v483_v36, %v485_v42  ;;  %v491_v48 = vcvt.f32.s32 %v485_v42 }
 0x192   : > { %v487_v44 = vsel %vm486_vm6, %v482_v43, -inf  ;;  %vm303_vm6 = vcmp.eq.s32.totalorder %v1012_v17, 66 }
 0x193   : > { %488 = vmax.xlane.f32.xlu1 %v487_v44  ;;  %v492_v52 = vshll.u32 %v491_v48, 16 }
 0x21c   : > { %v248_v46 = vpop.xlane.xlu1 %247 }
 0x21d   : > { %v249_v49 = vcvt.f32.s32 %v248_v46 }
 0x21f   : > { %v252_v50 = vadd.s32 %v251_v47, %v249_v49 }
 0x220   : > { %v489_v51 = vpop.xlane.xlu1 %488 }
 0x221   : > { %v490_v53 = vcvt.f32.s32 %v489_v51  ;;  %vm259_vm7 = vcmp.eq.s32.totalorder %v236_v29, %v252_v50  ;;  %v253_v7 = vand.u32 15, %v252_v50 }
 0x222   : > { %v260_v54 = vsel %vm259_vm7, 2147483648, %v236_v29 }
 0x223   : > { %v493_v55 = vadd.s32 %v492_v52, %v490_v53  ;;  %v261_v56 = vsel %vm237_vm4, %v260_v54, 2147483648  ;;  %v254_v9 = vsub.s32 15, %v253_v7 }
 0x224   : > { %v263_v57 = vshra.s32 %v261_v56, 16  ;;  %v262_v63 = vand.u32 65535, %v261_v56 }
 0x225   : > { %vm498_vm8 = vcmp.eq.s32.totalorder %v478_v30, %v493_v55  ;;  %v494_v10 = vand.u32 15, %v493_v55  ;;  %v256_v16 = vsel %vm255_vm11, %v254_v9, 0 }
 0x226   : > { %v265_v58 = vcvt.s32.f32 %v263_v57  ;;  %v499_v59 = vsel %vm498_vm8, 2147483648, %v478_v30  ;;  %v264_v1 = vcvt.s32.f32 %v262_v63  ;;  %v258_v27 = vsel %vm257_vm12, %v252_v50, %v256_v16 }
 0x227   : > { %v500_v60 = vsel %vm237_vm4, %v499_v59, 2147483648  ;;  %v495_v18 = vsub.s32 15, %v494_v10 }
 0x228   : > { %266 = vmax.xlane.f32.xlu0 %v265_v58  ;;  %v502_v61 = vshra.s32 %v500_v60, 16  ;;  %v501_v2 = vand.u32 65535, %v500_v60 }
 0x229   : > { %v496_v29 = vsel %vm255_vm11, %v495_v18, 0  ;;  %vm324_vm11 = vcmp.eq.s32.totalorder %v1012_v17, 3 }
 0x22a   : > { %v504_v62 = vcvt.s32.f32 %v502_v61  ;;  %v503_v5 = vcvt.s32.f32 %v501_v2  ;;  %v497_v37 = vsel %vm257_vm12, %v493_v55, %v496_v29  ;;  %vm326_vm12 = vcmp.eq.s32.totalorder %v1012_v17, 67 }
 0x22c   : > { %505 = vmax.xlane.f32.xlu1 %v504_v62 }
 0x2b5   : > { %v267_v0 = vpop.xlane.xlu0 %266 }
 0x2b6   : > { %vm268_vm9 = vcmp.eq.f32.partialorder %v265_v58, %v267_v0  ;;  %v273_v8 = vcvt.f32.s32 %v267_v0 }
 0x2b7   : > { %v269_v3 = vsel %vm268_vm9, %v264_v1, -inf }
 0x2b8   : > { %270 = vmax.xlane.f32.xlu0 %v269_v3  ;;  %v274_v12 = vshll.u32 %v273_v8, 16 }
 0x2b9   : > { %v506_v4 = vpop.xlane.xlu1 %505 }
 0x2ba   : > { %vm507_vm10 = vcmp.eq.f32.partialorder %v504_v62, %v506_v4  ;;  %v512_v13 = vcvt.f32.s32 %v506_v4 }
 0x2bb   : > { %v508_v6 = vsel %vm507_vm10, %v503_v5, -inf }
 0x2bc   : > { %509 = vmax.xlane.f32.xlu1 %v508_v6  ;;  %v513_v20 = vshll.u32 %v512_v13, 16 }
 0x345   : > { %v271_v11 = vpop.xlane.xlu0 %270 }
 0x346   : > { %v272_v14 = vcvt.f32.s32 %v271_v11 }
 0x348   : > { %v275_v15 = vadd.s32 %v274_v12, %v272_v14 }
 0x349   : > { %v510_v19 = vpop.xlane.xlu1 %509 }
 0x34a   : > { %v276_v21 = vand.u32 15, %v275_v15  ;;  %v511_v22 = vcvt.f32.s32 %v510_v19  ;;  %vm282_vm13 = vcmp.eq.s32.totalorder %v260_v54, %v275_v15 }
 0x34b   : > { %v283_v23 = vsel %vm282_vm13, 2147483648, %v260_v54 }
 0x34c   : > { %v277_v24 = vsub.s32 15, %v276_v21  ;;  %v514_v25 = vadd.s32 %v513_v20, %v511_v22  ;;  %v284_v26 = vsel %vm237_vm4, %v283_v23, 2147483648 }
 0x34d   : > { %v286_v28 = vshra.s32 %v284_v26, 16  ;;  %v285_v42 = vand.u32 65535, %v284_v26 }
 0x34e   : > { %v279_v30 = vsel %vm278_vm14, %v277_v24, %v258_v27  ;;  %v515_v31 = vand.u32 15, %v514_v25  ;;  %vm519_vm0 = vcmp.eq.s32.totalorder %v499_v59, %v514_v25 }
 0x34f   : > { %v281_v32 = vsel %vm280_vm15, %v275_v15, %v279_v30  ;;  %v288_v33 = vcvt.s32.f32 %v286_v28  ;;  %v520_v34 = vsel %vm519_vm0, 2147483648, %v499_v59  ;;  %v287_v44 = vcvt.s32.f32 %v285_v42 }
 0x350   : > { %v516_v35 = vsub.s32 15, %v515_v31  ;;  %v521_v36 = vsel %vm237_vm4, %v520_v34, 2147483648 }
 0x351   : > { %289 = vmax.xlane.f32.xlu0 %v288_v33  ;;  %v523_v38 = vshra.s32 %v521_v36, 16  ;;  %v522_v45 = vand.u32 65535, %v521_v36 }
 0x352   : > { %v517_v39 = vsel %vm278_vm14, %v516_v35, %v497_v37 }
 0x353   : > { %v518_v40 = vsel %vm280_vm15, %v514_v25, %v517_v39  ;;  %v525_v41 = vcvt.s32.f32 %v523_v38  ;;  %v524_v48 = vcvt.s32.f32 %v522_v45 }
 0x355   : > { %526 = vmax.xlane.f32.xlu1 %v525_v41 }
 0x3de   : > { %v290_v43 = vpop.xlane.xlu0 %289 }
 0x3df   : > { %vm291_vm1 = vcmp.eq.f32.partialorder %v288_v33, %v290_v43  ;;  %v296_v50 = vcvt.f32.s32 %v290_v43 }
 0x3e0   : > { %v292_v46 = vsel %vm291_vm1, %v287_v44, -inf  ;;  %vm347_vm1 = vcmp.eq.s32.totalorder %v1012_v17, 4 }
 0x3e1   : > { %293 = vmax.xlane.f32.xlu0 %v292_v46  ;;  %v297_v52 = vshll.u32 %v296_v50, 16 }
 0x3e2   : > { %v527_v47 = vpop.xlane.xlu1 %526 }
 0x3e3   : > { %vm528_vm2 = vcmp.eq.f32.partialorder %v525_v41, %v527_v47  ;;  %v533_v53 = vcvt.f32.s32 %v527_v47 }
 0x3e4   : > { %v529_v49 = vsel %vm528_vm2, %v524_v48, -inf  ;;  %vm349_vm2 = vcmp.eq.s32.totalorder %v1012_v17, 68 }
 0x3e5   : > { %530 = vmax.xlane.f32.xlu1 %v529_v49  ;;  %v534_v57 = vshll.u32 %v533_v53, 16 }
 0x46e   : > { %v294_v51 = vpop.xlane.xlu0 %293 }
 0x46f   : > { %v295_v54 = vcvt.f32.s32 %v294_v51 }
 0x471   : > { %v298_v55 = vadd.s32 %v297_v52, %v295_v54 }
 0x472   : > { %v531_v56 = vpop.xlane.xlu1 %530 }
 0x473   : > { %v299_v58 = vand.u32 15, %v298_v55  ;;  %v532_v59 = vcvt.f32.s32 %v531_v56  ;;  %vm305_vm3 = vcmp.eq.s32.totalorder %v283_v23, %v298_v55 }
 0x474   : > { %v306_v60 = vsel %vm305_vm3, 2147483648, %v283_v23 }
 0x475   : > { %v300_v61 = vsub.s32 15, %v299_v58  ;;  %v535_v62 = vadd.s32 %v534_v57, %v532_v59  ;;  %v307_v63 = vsel %vm237_vm4, %v306_v60, 2147483648 }
 0x476   : > { %v309_v0 = vshra.s32 %v307_v63, 16  ;;  %v308_v12 = vand.u32 65535, %v307_v63 }
 0x477   : > { %v302_v1 = vsel %vm301_vm5, %v300_v61, %v281_v32  ;;  %v536_v2 = vand.u32 15, %v535_v62  ;;  %vm540_vm7 = vcmp.eq.s32.totalorder %v520_v34, %v535_v62 }
 0x478   : > { %v304_v3 = vsel %vm303_vm6, %v298_v55, %v302_v1  ;;  %v311_v4 = vcvt.s32.f32 %v309_v0  ;;  %v541_v5 = vsel %vm540_vm7, 2147483648, %v520_v34  ;;  %v310_v14 = vcvt.s32.f32 %v308_v12 }
 0x479   : > { %v537_v6 = vsub.s32 15, %v536_v2  ;;  %v542_v7 = vsel %vm237_vm4, %v541_v5, 2147483648  ;;  %vm372_vm7 = vcmp.eq.s32.totalorder %v1012_v17, 69 }
 0x47a   : > { %312 = vmax.xlane.f32.xlu0 %v311_v4  ;;  %v544_v8 = vshra.s32 %v542_v7, 16  ;;  %v543_v15 = vand.u32 65535, %v542_v7 }
 0x47b   : > { %v538_v9 = vsel %vm301_vm5, %v537_v6, %v518_v40 }
 0x47c   : > { %v539_v10 = vsel %vm303_vm6, %v535_v62, %v538_v9  ;;  %v546_v11 = vcvt.s32.f32 %v544_v8  ;;  %v545_v19 = vcvt.s32.f32 %v543_v15  ;;  %vm370_vm6 = vcmp.eq.s32.totalorder %v1012_v17, 5 }
 0x47e   : > { %547 = vmax.xlane.f32.xlu1 %v546_v11 }
 0x507   : > { %v313_v13 = vpop.xlane.xlu0 %312 }
 0x508   : > { %vm314_vm8 = vcmp.eq.f32.partialorder %v311_v4, %v313_v13  ;;  %v319_v21 = vcvt.f32.s32 %v313_v13 }
 0x509   : > { %v315_v16 = vsel %vm314_vm8, %v310_v14, -inf }
 0x50a   : > { %316 = vmax.xlane.f32.xlu0 %v315_v16  ;;  %v320_v23 = vshll.u32 %v319_v21, 16 }
 0x50b   : > { %v548_v18 = vpop.xlane.xlu1 %547 }
 0x50c   : > { %vm549_vm9 = vcmp.eq.f32.partialorder %v546_v11, %v548_v18  ;;  %v554_v24 = vcvt.f32.s32 %v548_v18 }
 0x50d   : > { %v550_v20 = vsel %vm549_vm9, %v545_v19, -inf }
 0x50e   : > { %551 = vmax.xlane.f32.xlu1 %v550_v20  ;;  %v555_v28 = vshll.u32 %v554_v24, 16 }
 0x597   : > { %v317_v22 = vpop.xlane.xlu0 %316 }
 0x598   : > { %v318_v25 = vcvt.f32.s32 %v317_v22 }
 0x59a   : > { %v321_v26 = vadd.s32 %v320_v23, %v318_v25 }
 0x59b   : > { %v552_v27 = vpop.xlane.xlu1 %551 }
 0x59c   : > { %v322_v29 = vand.u32 15, %v321_v26  ;;  %v553_v30 = vcvt.f32.s32 %v552_v27  ;;  %vm328_vm10 = vcmp.eq.s32.totalorder %v306_v60, %v321_v26 }
 0x59d   : > { %v329_v31 = vsel %vm328_vm10, 2147483648, %v306_v60  ;;  %vm379_vm10 = vcmp.ge.s32.totalorder %v1012_v17, 64 }
 0x59e   : > { %v323_v32 = vsub.s32 15, %v322_v29  ;;  %v556_v33 = vadd.s32 %v555_v28, %v553_v30  ;;  %v330_v34 = vsel %vm237_vm4, %v329_v31, 2147483648 }
 0x59f   : > { %v332_v35 = vshra.s32 %v330_v34, 16  ;;  %v331_v47 = vand.u32 65535, %v330_v34 }
 0x5a0   : > { %v325_v36 = vsel %vm324_vm11, %v323_v32, %v304_v3  ;;  %v557_v37 = vand.u32 15, %v556_v33  ;;  %vm561_vm13 = vcmp.eq.s32.totalorder %v541_v5, %v556_v33 }
 0x5a1   : > { %v327_v38 = vsel %vm326_vm12, %v321_v26, %v325_v36  ;;  %v334_v39 = vcvt.s32.f32 %v332_v35  ;;  %v562_v40 = vsel %vm561_vm13, 2147483648, %v541_v5  ;;  %v333_v49 = vcvt.s32.f32 %v331_v47 }
 0x5a2   : > { %v558_v41 = vsub.s32 15, %v557_v37  ;;  %v563_v42 = vsel %vm237_vm4, %v562_v40, 2147483648  ;;  %v917_v26 = vmov 64   ;;  %vm395_vm13 = vcmp.lt.s32.totalorder %v1012_v17, 64 }
 0x5a3   : > { %335 = vmax.xlane.f32.xlu0 %v334_v39  ;;  %v565_v43 = vshra.s32 %v563_v42, 16  ;;  %v564_v50 = vand.u32 65535, %v563_v42  ;;  %841 = vset.pattern.permute.xlu1 %v917_v26 }
 0x5a4   : > { %v559_v44 = vsel %vm324_vm11, %v558_v41, %v539_v10  ;;  %840 = vset.pattern.permute.xlu0 %v917_v26  ;;  %vm380_vm11 = vcmp.lt.s32.totalorder %v1012_v17, 70 }
 0x5a5   : > { %v560_v45 = vsel %vm326_vm12, %v556_v33, %v559_v44  ;;  %v567_v46 = vcvt.s32.f32 %v565_v43  ;;  %v566_v53 = vcvt.s32.f32 %v564_v50  ;;  %vm381_vm12 = vmand %vm379_vm10, %vm380_vm11 }
 0x5a7   : > { %568 = vmax.xlane.f32.xlu1 %v567_v46 }
 0x630   : > { %v336_v48 = vpop.xlane.xlu0 %335 }
 0x631   : > { %vm337_vm14 = vcmp.eq.f32.partialorder %v334_v39, %v336_v48  ;;  %v342_v55 = vcvt.f32.s32 %v336_v48 }
 0x632   : > { %v338_v51 = vsel %vm337_vm14, %v333_v49, -inf }
 0x633   : > { %339 = vmax.xlane.f32.xlu0 %v338_v51  ;;  %v343_v57 = vshll.u32 %v342_v55, 16 }
 0x634   : > { %v569_v52 = vpop.xlane.xlu1 %568 }
 0x635   : > { %vm570_vm15 = vcmp.eq.f32.partialorder %v567_v46, %v569_v52  ;;  %v575_v58 = vcvt.f32.s32 %v569_v52 }
 0x636   : > { %v571_v54 = vsel %vm570_vm15, %v566_v53, -inf }
 0x637   : > { %572 = vmax.xlane.f32.xlu1 %v571_v54  ;;  %v576_v62 = vshll.u32 %v575_v58, 16 }
 0x6c0   : > { %v340_v56 = vpop.xlane.xlu0 %339 }
 0x6c1   : > { %v341_v59 = vcvt.f32.s32 %v340_v56 }
 0x6c3   : > { %v344_v60 = vadd.s32 %v343_v57, %v341_v59 }
 0x6c4   : > { %v573_v61 = vpop.xlane.xlu1 %572 }
 0x6c5   : > { %v345_v63 = vand.u32 15, %v344_v60  ;;  %v574_v0 = vcvt.f32.s32 %v573_v61  ;;  %vm351_vm0 = vcmp.eq.s32.totalorder %v329_v31, %v344_v60 }
 0x6c6   : > { %v352_v1 = vsel %vm351_vm0, 2147483648, %v329_v31 }
 0x6c7   : > { %v346_v2 = vsub.s32 15, %v345_v63  ;;  %v577_v3 = vadd.s32 %v576_v62, %v574_v0  ;;  %v353_v4 = vsel %vm237_vm4, %v352_v1, 2147483648 }
 0x6c8   : > { %v355_v5 = vshra.s32 %v353_v4, 16  ;;  %v354_v18 = vand.u32 65535, %v353_v4 }
 0x6c9   : > { %v348_v6 = vsel %vm347_vm1, %v346_v2, %v327_v38  ;;  %v578_v7 = vand.u32 15, %v577_v3  ;;  %vm582_vm3 = vcmp.eq.s32.totalorder %v562_v40, %v577_v3 }
 0x6ca   : > { %v350_v8 = vsel %vm349_vm2, %v344_v60, %v348_v6  ;;  %v357_v9 = vcvt.s32.f32 %v355_v5  ;;  %v583_v10 = vsel %vm582_vm3, 2147483648, %v562_v40  ;;  %v356_v20 = vcvt.s32.f32 %v354_v18 }
 0x6cb   : > { %v579_v11 = vsub.s32 15, %v578_v7  ;;  %v584_v12 = vsel %vm237_vm4, %v583_v10, 2147483648 }
 0x6cc   : > { %358 = vmax.xlane.f32.xlu0 %v357_v9  ;;  %v586_v13 = vshra.s32 %v584_v12, 16  ;;  %v585_v21 = vand.u32 65535, %v584_v12 }
 0x6cd   : > { %v580_v14 = vsel %vm347_vm1, %v579_v11, %v560_v45 }
 0x6ce   : > { %v581_v15 = vsel %vm349_vm2, %v577_v3, %v580_v14  ;;  %v588_v16 = vcvt.s32.f32 %v586_v13  ;;  %v587_v24 = vcvt.s32.f32 %v585_v21 }
 0x6d0   : > { %589 = vmax.xlane.f32.xlu1 %v588_v16 }
 0x759   : > { %v359_v19 = vpop.xlane.xlu0 %358 }
 0x75a   : > { %vm360_vm5 = vcmp.eq.f32.partialorder %v357_v9, %v359_v19  ;;  %v365_v27 = vcvt.f32.s32 %v359_v19 }
 0x75b   : > { %v361_v22 = vsel %vm360_vm5, %v356_v20, -inf }
 0x75c   : > { %362 = vmax.xlane.f32.xlu0 %v361_v22  ;;  %v366_v29 = vshll.u32 %v365_v27, 16 }
 0x75d   : > { %v590_v23 = vpop.xlane.xlu1 %589 }
 0x75e   : > { %vm591_vm4 = vcmp.eq.f32.partialorder %v588_v16, %v590_v23  ;;  %v596_v30 = vcvt.f32.s32 %v590_v23 }
 0x75f   : > { %v592_v25 = vsel %vm591_vm4, %v587_v24, -inf }
 0x760   : > { %593 = vmax.xlane.f32.xlu1 %v592_v25  ;;  %v597_v34 = vshll.u32 %v596_v30, 16 }
 0x7e9   : > { %v363_v28 = vpop.xlane.xlu0 %362 }
 0x7ea   : > { %v364_v31 = vcvt.f32.s32 %v363_v28 }
 0x7ec   : > { %v367_v32 = vadd.s32 %v366_v29, %v364_v31 }
 0x7ed   : > { %v594_v33 = vpop.xlane.xlu1 %593 }
 0x7ee   : > { %v368_v35 = vand.u32 15, %v367_v32  ;;  %v595_v36 = vcvt.f32.s32 %v594_v33 }
 0x7f0   : > { %v369_v37 = vsub.s32 15, %v368_v35  ;;  %v598_v38 = vadd.s32 %v597_v34, %v595_v36 }
 0x7f2   : > { %v371_v39 = vsel %vm370_vm6, %v369_v37, %v350_v8  ;;  %v599_v40 = vand.u32 15, %v598_v38 }
 0x7f3   : > { %v373_v41 = vsel %vm372_vm7, %v367_v32, %v371_v39 }
 0x7f4   : > { %v600_v42 = vsub.s32 15, %v599_v40  ;;  %v374_v43 = vand.u32 4294967280, %v373_v41 }
 0x7f6   : > { %v601_v44 = vsel %vm370_vm6, %v600_v42, %v581_v15  ;;  %vm375_vm8 = vcmp.lt.s32.totalorder %v374_v43, 0  ;;  %v376_v45 = vxor.u32 2147483647, %v374_v43 }
 0x7f7   : > { %v602_v46 = vsel %vm372_vm7, %v598_v38, %v601_v44 }
 0x7f8   : > { %v377_v47 = vsel %vm375_vm8, %v376_v45, %v374_v43  ;;  %v603_v48 = vand.u32 4294967280, %v602_v46 }
 0x7f9   : > { %383 = vperm.xlu0 %840, %v377_v47  }
 0x7fa   : > { %vm604_vm9 = vcmp.lt.s32.totalorder %v603_v48, 0  ;;  %v605_v49 = vxor.u32 2147483647, %v603_v48 }
 0x7fc   : > { %v606_v50 = vsel %vm604_vm9, %v605_v49, %v603_v48 }
 0x7fd   : > { %609 = vperm.xlu1 %841, %v606_v50  }
 0x878   : > { %v384_v51 = vpop.permute.xlu0 %383 }
 0x879   : > { %v386_v52 = vsub.f32 %v377_v47, %v384_v51 }
 0x87b   : > { %v387_v53 = vmul.f32 1.442695, %v386_v52 }
 0x87c   : > { %v610_v54 = vpop.permute.xlu1 %609 }
 0x87d   : > { %842 = vpow2.f32 %v387_v53  ;;  %v612_v55 = vsub.f32 %v606_v50, %v610_v54 }
 0x87f   : > { %v613_v56 = vmul.f32 1.442695, %v612_v55 }
 0x881   : > { %844 = vpow2.f32 %v613_v56 }
 0x887   : > { %v843_v57 = vpop.eup %842 }
 0x888   : > { %v389_v58 = vsel %vm381_vm12, %v843_v57, 0.0 }
 0x889   : > { %390 = vadd.xlane.f32.xlu1 %v389_v58 }
 0x88b   : > { %v845_v59 = vpop.eup %844 }
 0x88c   : > { %v615_v60 = vsel %vm381_vm12, %v845_v59, 0.0 }
 0x88d   : > { %616 = vadd.xlane.f32.xlu0 %v615_v60 }
 0x916   : > { %v391_v61 = vpop.xlane.xlu1 %390 }
 0x917   : > { %v392_v62 = vadd.f32 1e-20, %v391_v61 }
 0x919   : > { %846 = vrcp.f32 %v392_v62 }
 0x91a   : > { %v617_v63 = vpop.xlane.xlu0 %616 }
 0x91b   : > { %v618_v0 = vadd.f32 1e-20, %v617_v63 }
 0x91d   : > { %848 = vrcp.f32 %v618_v0 }
 0x923   : > { %v847_v1 = vpop.eup %846 }
 0x924   : > { %v394_v2 = vmul.f32 %v847_v1, %v389_v58 }
 0x926   : > { %v397_v3 = vsel %vm395_vm13, %v373_v41, %v394_v2 }
 0x927   : > { %v849_v4 = vpop.eup %848  ;;  %398 = vst [vmem:[%s137_s26] sm:$0xff] %v397_v3 }
 0x928   : > { %v620_v5 = vmul.f32 %v849_v4, %v615_v60 }
 0x92a   : > { %v622_v17 = vsel %vm395_vm13, %v602_v46, %v620_v5 }
 0x92b   : > { %623 = vst [vmem:[%s137_s26 + $0x8] sm:$0xff] %v622_v17 }
 0x92c   : > { %863 = shalt.err (!%p860_p3)
}
 0x92d   : > { %s864_s7 = scalar_lea.hbm %s1087_s30, 256  ;;  %s868_s16 = scalar_lea.hbm %s1134_s2, 512 }
 0x92e   : > { %p865_p4 = scmp.ne.s32.totalorder %s1087_s30, %s864_s7  ;;  %p869_p9 = scmp.lt.u32.totalorder %s1087_s30, %s1134_s2 }
 0x92f   : > { %p870_p10 = scmp.lt.u32.totalorder %s868_s16, %s864_s7  ;;  %p872_p12 = scmp.lt.u32.totalorder %s864_s7, %s1087_s30 }
 0x930   : > { %p866_p7 = pnand %p865_p4, %p974_p5 }
 0x931   : > { %p871_p11 = por %p870_p10, %p869_p9 }
 0x932   : > { %p867_p8 = pneg %p866_p7 }
 0x933   : > { %p873_p13 = por %p872_p12, %p871_p11 }
 0x935   : > { %p874_p0 = pnand %p873_p13, %p867_p8 }
 0x937   : > { %877 = shalt.err (!%p874_p0)
}
 0x938   : > { %s919_s22 = smov 128   ;;  %s920_s23 = smov 8  }
 0x939   : > { %795 = dma.vmem_to_hbm [thread:$0]  (%p974_p5), %s1089_s27, 256, %s1087_s30, %s1091_s3, %s919_s22, %s919_s22, %s920_s23  }
 0x93a PF: > { %p801_p1 = scmp.ge.s32.totalorder %s912_s12, 2  ;;  %s653_s24 = sand.u32 1, %s900_s9  }
 0x93b   : > { %s654_s25 = scalar_lea.sflag [#allocation3], %s653_s24 }
 0x93c   : > { %p798_p2 = pnand %p801_p1, %p978_p6 }
 0x93e   : > { %895 = dma.done.wait (!%p798_p2), %s654_s25, 256  }
 0x93f   : > { %897 = vsyncadd (!%p798_p2), %s654_s25, 4294967040  ;;  %p12_p3 = scmp.ge.s32.totalorder %s961_s15, 4   ;;  %s1137_s9 = smov %s904_s10 }
 0x940   : > { %s1138_s10 = smov %s908_s11  ;;  %s1139_s11 = smov %s972_s18 }
 0x941   : > { %s1140_s12 = smov %s961_s15  ;;  %14 = sbr.rel (!%p12_p3) target bundleno = 3 (0x3), region = 63 }
 0x948   :  { %659 = vsyncpa [#allocation3], 1 }
 0x949   :  { %661 = vsyncpa [#allocation3 + $0x1], 1 }

</bundles_post_ra>
